<compile_context>
chip_gen: v5e
topology: v5e:2x2
jax: 0.10.0
libtpu: 0.0.40
codegen_flags: <defaults>
</compile_context>

<pallas_src>
import math
import functools

import jax
import jax.numpy as jnp
from jax.experimental import pallas as pl
from jax.experimental.pallas import tpu as pltpu


LANE = 128                      # TPU lane width
GEN_HIDDEN = 128                # generator hidden width (lane dense)
VMEM_LIMIT_BYTES = 64 * 1024 * 1024   # safe on v5e/v6e (128 MiB) and v7x (64 MiB)


def _round_up(x, m):
    return ((x + m - 1) // m) * m


def _preferred_batch_tile():
    """Rows of the batch processed per grid step (v5e: 128, v6e/v7x: 256)."""
    try:
        kind = jax.devices()[0].device_kind.lower()
    except Exception:
        return 256
    if "v5" in kind and ("lite" in kind or "v5e" in kind):
        return 128
    return 256


# ----------------------------------------------------------------------------
# Generator (hoisted out of the kernels — loop-invariant, tiny, plain XLA)
# ----------------------------------------------------------------------------
def _generate_w(z, g1, b1, g2, b2, d_in, D, compute_dtype):
    """Stand-in generator MLP: W = reshape(tanh(z@G1+b1)@G2+b2, (d_in, D))."""
    h = jnp.tanh(jnp.dot(z, g1) + b1)                  # (1, H)
    w_flat = jnp.dot(h, g2) + b2                       # (1, d_in*D)
    return w_flat.reshape(d_in, D).astype(compute_dtype)


# ----------------------------------------------------------------------------
# Pallas kernels (one fused pallas_call per GRFF layer)
# ----------------------------------------------------------------------------
def grff_layer_kernel(x_ref, w_ref, feat_ref, *, D, compute_dtype):
    """RFF features for an intermediate layer: [cos(xW), sin(xW)] / sqrt(D)."""
    x = x_ref[...].astype(compute_dtype)
    proj = jnp.dot(x, w_ref[...], preferred_element_type=jnp.float32)   # (TN, D)
    scale = 1.0 / math.sqrt(D)
    cos_f = jnp.cos(proj) * scale
    sin_f = jnp.sin(proj) * scale
    if D % LANE == 0:
        # Both halves are already lane-dense; two unmasked sliced stores.
        feat_ref[:, :D] = cos_f
        feat_ref[:, D:] = sin_f
    else:
        # D < 128 (e.g. demo D=64): build the full (TN, 2D) block in registers
        # and issue one full-width store instead of two masked sub-lane stores.
        feat_ref[...] = jnp.concatenate([cos_f, sin_f], axis=-1)


def grff_last_layer_kernel(x_ref, w_ref, fcw_ref, fcb_ref, out_ref,
                           *, D, compute_dtype):
    """RFF features + final fc, fully fused (features never leave VMEM)."""
    x = x_ref[...].astype(compute_dtype)
    proj = jnp.dot(x, w_ref[...], preferred_element_type=jnp.float32)   # (TN, D)
    scale = 1.0 / math.sqrt(D)
    cos_f = jnp.cos(proj) * scale
    sin_f = jnp.sin(proj) * scale
    if D < LANE:
        # 2*D <= 128: one K=2D matmul on the concatenated features (better MXU
        # contraction fill than two K=D matmuls).
        feats = jnp.concatenate([cos_f, sin_f], axis=-1).astype(compute_dtype)
        acc = jnp.dot(feats, fcw_ref[...], preferred_element_type=jnp.float32)
    else:
        # D >= 128: split fc weight into cos/sin halves, avoid the concat copy.
        acc = (
            jnp.dot(cos_f.astype(compute_dtype), fcw_ref[0:D, :],
                    preferred_element_type=jnp.float32)
            + jnp.dot(sin_f.astype(compute_dtype), fcw_ref[D:2 * D, :],
                      preferred_element_type=jnp.float32)
        )
    out_ref[...] = acc + fcb_ref[...]


# ----------------------------------------------------------------------------
# pallas_call wrappers
# ----------------------------------------------------------------------------
def _const_spec(shape):
    zeros = (0,) * len(shape)
    return pl.BlockSpec(shape, lambda i: zeros)


def _compiler_params():
    return pltpu.CompilerParams(
        dimension_semantics=("parallel",),
        vmem_limit_bytes=VMEM_LIMIT_BYTES,
    )


def grff_layer(x, w, D, tile, compute_dtype):
    n, d_in = x.shape
    assert n % tile == 0, "batch must be padded to a multiple of the tile size"
    kernel = functools.partial(grff_layer_kernel, D=D, compute_dtype=compute_dtype)
    return pl.pallas_call(
        kernel,
        out_shape=jax.ShapeDtypeStruct((n, 2 * D), jnp.float32),
        grid=(n // tile,),
        in_specs=[
            pl.BlockSpec((tile, d_in), lambda i: (i, 0)),
            _const_spec(w.shape),
        ],
        out_specs=pl.BlockSpec((tile, 2 * D), lambda i: (i, 0)),
        compiler_params=_compiler_params(),
    )(x, w)


def grff_last_layer(x, w, fc_w, fc_b, D, c_pad, tile, compute_dtype):
    n, d_in = x.shape
    assert n % tile == 0, "batch must be padded to a multiple of the tile size"
    kernel = functools.partial(
        grff_last_layer_kernel, D=D, compute_dtype=compute_dtype)
    return pl.pallas_call(
        kernel,
        out_shape=jax.ShapeDtypeStruct((n, c_pad), jnp.float32),
        grid=(n // tile,),
        in_specs=[
            pl.BlockSpec((tile, d_in), lambda i: (i, 0)),
            _const_spec(w.shape),
            _const_spec(fc_w.shape),
            _const_spec(fc_b.shape),
        ],
        out_specs=pl.BlockSpec((tile, c_pad), lambda i: (i, 0)),
        compiler_params=_compiler_params(),
    )(x, w, fc_w, fc_b)


# ----------------------------------------------------------------------------
# GRFFNet in JAX
# ----------------------------------------------------------------------------
def _forward_impl(params, x, noise, *, layer_dims, num_layers, num_classes,
                  c_pad, nz_pad, pref_tile, compute_dtype):
    n = x.shape[0]
    # Batch tile: capped by the (padded) batch, multiple of 16 for bf16 packing.
    tile = min(pref_tile, _round_up(n, 16))
    n_pad = _round_up(n, tile)
    if n_pad != n:
        x = jnp.pad(x, ((0, n_pad - n), (0, 0)))

    for idx in range(num_layers):
        g1, b1, g2, b2 = params["layers"][idx]
        d_in, d_out = layer_dims[idx]
        z = noise[idx].reshape(1, -1)
        z = jnp.pad(z, ((0, 0), (0, nz_pad - z.shape[1])))
        # Loop-invariant generator: W computed once per layer, outside the grid.
        w = _generate_w(z, g1, b1, g2, b2, d_in, d_out, compute_dtype)
        if idx == num_layers - 1:
            fc_w = params["fc_w"].astype(compute_dtype)     # cast once, not per step
            x = grff_last_layer(x, w, fc_w, params["fc_b"],
                                d_out, c_pad, tile, compute_dtype)
        else:
            x = grff_layer(x, w, d_out, tile, compute_dtype)

    return x[:n, :num_classes]


class GRFFNetPallas:
    def __init__(self, key, num_classes, num_layers, d, D, nz=100,
                 gen_hidden=GEN_HIDDEN, compute_dtype=jnp.bfloat16):
        """compute_dtype: MXU operand dtype (bf16 by default; f32 accumulate).

        Pass jnp.float32 for a bitwise-stable full-precision reference.
        """
        self.d = d
        self.D = D
        self.nz = nz
        self.nz_pad = _round_up(nz, LANE)          # 100 -> 128 (lane-dense MXU K)
        self.num_layers = num_layers
        self.num_classes = num_classes
        self.gen_hidden = gen_hidden
        self.compute_dtype = compute_dtype

        layer_dims = []
        layers = []
        for idx in range(num_layers):
            d_in = d if idx == 0 else 2 * D[idx - 1]
            d_out = D[idx]
            layer_dims.append((d_in, d_out))
            key, k1, k2, k3, k4 = jax.random.split(key, 5)
            # g1 allocated at the padded noise width; rows >= nz are inert
            # because the noise vector is zero-padded before use.
            g1 = jax.random.normal(k1, (self.nz_pad, gen_hidden), jnp.float32) * 0.05
            b1 = jax.random.normal(k2, (1, gen_hidden), jnp.float32) * 0.05
            g2 = jax.random.normal(k3, (gen_hidden, d_in * d_out), jnp.float32) * 0.05
            b2 = jax.random.normal(k4, (1, d_in * d_out), jnp.float32) * 0.05
            layers.append((g1, b1, g2, b2))
        self.layer_dims = tuple(layer_dims)

        key, kw, kb = jax.random.split(key, 3)
        fc_in = 2 * D[-1]
        bound = 1.0 / math.sqrt(fc_in)
        fc_w = jax.random.uniform(kw, (fc_in, num_classes), jnp.float32, -bound, bound)
        fc_b = jax.random.uniform(kb, (1, num_classes), jnp.float32, -bound, bound)
        # Pad the class dim to 128 lanes so the fused kernel's output store is a
        # full-width vst; real logits are sliced off outside the kernel.
        self.c_pad = _round_up(max(num_classes, 1), LANE)
        fc_w_pad = jnp.zeros((fc_in, self.c_pad), jnp.float32).at[:, :num_classes].set(fc_w)
        fc_b_pad = jnp.zeros((1, self.c_pad), jnp.float32).at[:, :num_classes].set(fc_b)

        self.params = {"layers": layers, "fc_w": fc_w_pad, "fc_b": fc_b_pad}

        self._forward = jax.jit(functools.partial(
            _forward_impl,
            layer_dims=self.layer_dims,
            num_layers=self.num_layers,
            num_classes=self.num_classes,
            c_pad=self.c_pad,
            nz_pad=self.nz_pad,
            pref_tile=_preferred_batch_tile(),
            compute_dtype=self.compute_dtype,
        ))

    def forward(self, x, noise):
        """x: (N, d) float32; noise: (num_layers, 1, nz) float32 -> (N, C) logits."""
        return self._forward(self.params, x, noise)


# ----------------------------------------------------------------------------
if __name__ == "__main__":
    key = jax.random.PRNGKey(0)
    k_model, k_x, k_noise = jax.random.split(key, 3)

    # Small shapes consistent with the module: input dim d=16, two GRFF layers
    # with D=[64, 64] (so RFF feature dim 2*D = 128 is lane-dense), 4 classes,
    # batch N=16, noise dim nz=100 (padded to 128 inside the wrapper).
    d = 16
    D = [64, 64]
    num_classes = 4
    num_layers = 2
    nz = 100
    N = 16

    net = GRFFNetPallas(k_model, num_classes, num_layers, d, D, nz=nz)

    x = jax.random.normal(k_x, (N, d), jnp.float32)
    noise = jax.random.normal(k_noise, (num_layers, 1, nz), jnp.float32)

    out = jax.block_until_ready(net.forward(x, noise))
    assert out.shape == (N, num_classes)
    assert bool(jnp.all(jnp.isfinite(out)))
    print("KERNEL_OK")
</pallas_src>

<mosaic_0001>
module attributes {stable_mosaic.version = 11 : i64} {
  func.func @grff_last_layer_kernel(%arg0: i32, %arg1: memref<16x128xf32, #tpu.memory_space<vmem>>, %arg2: memref<128x64xbf16, #tpu.memory_space<vmem>>, %arg3: memref<128x128xbf16, #tpu.memory_space<vmem>>, %arg4: memref<1x128xf32, #tpu.memory_space<vmem>>, %arg5: memref<16x128xf32, #tpu.memory_space<vmem>>) attributes {dimension_semantics = [#tpu.dimension_semantics<parallel>], iteration_bounds = array<i64: 1>, scalar_prefetch = 0 : i64, scratch_operands = 0 : i64, tpu.core_type = #tpu.core_type<tc>, window_params = [{transform_indices = @transform_0, window_bounds = array<i64: 16, 128>}, {pipeline_mode = #tpu.pipeline_mode<synchronous>, transform_indices = @transform_1, window_bounds = array<i64: 128, 64>}, {pipeline_mode = #tpu.pipeline_mode<synchronous>, transform_indices = @transform_2, window_bounds = array<i64: 128, 128>}, {pipeline_mode = #tpu.pipeline_mode<synchronous>, transform_indices = @transform_3, window_bounds = array<i64: 1, 128>}, {transform_indices = @transform_4, window_bounds = array<i64: 16, 128>}]} {
    %c0 = arith.constant 0 : index
    %c0_0 = arith.constant 0 : index
    %0 = vector.load %arg1[%c0, %c0_0] : memref<16x128xf32, #tpu.memory_space<vmem>>, vector<16x128xf32>
    %1 = arith.truncf %0 : vector<16x128xf32> to vector<16x128xbf16>
    %c0_1 = arith.constant 0 : index
    %c0_2 = arith.constant 0 : index
    %2 = vector.load %arg2[%c0_1, %c0_2] : memref<128x64xbf16, #tpu.memory_space<vmem>>, vector<128x64xbf16>
    %cst = arith.constant dense<0.000000e+00> : vector<16x64xf32>
    %3 = tpu.matmul %1, %2, %cst {dimension_numbers = #tpu.dot_dimension_numbers<[1], [0], [0], [1], [0, 0, 1, 1], [], []>} : vector<16x128xbf16>, vector<128x64xbf16>, vector<16x64xf32> -> vector<16x64xf32>
    %4 = math.cos %3 : vector<16x64xf32>
    %cst_3 = arith.constant 1.250000e-01 : f32
    %5 = vector.broadcast %cst_3 : f32 to vector<16x64xf32>
    %6 = arith.mulf %4, %5 : vector<16x64xf32>
    %7 = math.sin %3 : vector<16x64xf32>
    %cst_4 = arith.constant 1.250000e-01 : f32
    %8 = vector.broadcast %cst_4 : f32 to vector<16x64xf32>
    %9 = arith.mulf %7, %8 : vector<16x64xf32>
    %10 = tpu.concatenate %6, %9 in 1 : vector<16x64xf32>, vector<16x64xf32> -> vector<16x128xf32>
    %11 = arith.truncf %10 : vector<16x128xf32> to vector<16x128xbf16>
    %c0_5 = arith.constant 0 : index
    %c0_6 = arith.constant 0 : index
    %12 = vector.load %arg3[%c0_5, %c0_6] : memref<128x128xbf16, #tpu.memory_space<vmem>>, vector<128x128xbf16>
    %cst_7 = arith.constant dense<0.000000e+00> : vector<16x128xf32>
    %13 = tpu.matmul %11, %12, %cst_7 {dimension_numbers = #tpu.dot_dimension_numbers<[1], [0], [0], [1], [0, 0, 1, 1], [], []>} : vector<16x128xbf16>, vector<128x128xbf16>, vector<16x128xf32> -> vector<16x128xf32>
    %c0_8 = arith.constant 0 : index
    %c0_9 = arith.constant 0 : index
    %14 = vector.load %arg4[%c0_8, %c0_9] : memref<1x128xf32, #tpu.memory_space<vmem>>, vector<1x128xf32>
    %15 = vector.broadcast %14 : vector<1x128xf32> to vector<16x128xf32>
    %16 = arith.addf %13, %15 : vector<16x128xf32>
    %c0_10 = arith.constant 0 : index
    %c0_11 = arith.constant 0 : index
    %17 = vector.load %arg5[%c0_10, %c0_11] : memref<16x128xf32, #tpu.memory_space<vmem>>, vector<16x128xf32>
    tpu.vector_store %arg5[%c0_10, %c0_11], %16 {strides = array<i32>} : memref<16x128xf32, #tpu.memory_space<vmem>>, vector<16x128xf32>,
    return
  }
  func.func @transform_0(%arg0: i32) -> (i32, i32) {
    %c0_i32 = arith.constant 0 : i32
    %c0_i32_0 = arith.constant 0 : i32
    return %arg0, %c0_i32 : i32, i32
  }
  func.func @transform_1(%arg0: i32) -> (i32, i32) {
    %c0_i32 = arith.constant 0 : i32
    %c0_i32_0 = arith.constant 0 : i32
    %c0_i32_1 = arith.constant 0 : i32
    return %c0_i32, %c0_i32_0 : i32, i32
  }
  func.func @transform_2(%arg0: i32) -> (i32, i32) {
    %c0_i32 = arith.constant 0 : i32
    %c0_i32_0 = arith.constant 0 : i32
    %c0_i32_1 = arith.constant 0 : i32
    return %c0_i32, %c0_i32_0 : i32, i32
  }
  func.func @transform_3(%arg0: i32) -> (i32, i32) {
    %c0_i32 = arith.constant 0 : i32
    %c0_i32_0 = arith.constant 0 : i32
    %c0_i32_1 = arith.constant 0 : i32
    return %c0_i32, %c0_i32_0 : i32, i32
  }
  func.func @transform_4(%arg0: i32) -> (i32, i32) {
    %c0_i32 = arith.constant 0 : i32
    %c0_i32_0 = arith.constant 0 : i32
    return %arg0, %c0_i32 : i32, i32
  }
}

module attributes {stable_mosaic.version = 11 : i64} {
  func.func @grff_layer_kernel(%arg0: i32, %arg1: memref<16x16xf32, #tpu.memory_space<vmem>>, %arg2: memref<16x64xbf16, #tpu.memory_space<vmem>>, %arg3: memref<16x128xf32, #tpu.memory_space<vmem>>) attributes {dimension_semantics = [#tpu.dimension_semantics<parallel>], iteration_bounds = array<i64: 1>, scalar_prefetch = 0 : i64, scratch_operands = 0 : i64, tpu.core_type = #tpu.core_type<tc>, window_params = [{transform_indices = @transform_0, window_bounds = array<i64: 16, 16>}, {pipeline_mode = #tpu.pipeline_mode<synchronous>, transform_indices = @transform_1, window_bounds = array<i64: 16, 64>}, {transform_indices = @transform_2, window_bounds = array<i64: 16, 128>}]} {
    %c0 = arith.constant 0 : index
    %c0_0 = arith.constant 0 : index
    %0 = vector.load %arg1[%c0, %c0_0] : memref<16x16xf32, #tpu.memory_space<vmem>>, vector<16x16xf32>
    %1 = arith.truncf %0 : vector<16x16xf32> to vector<16x16xbf16>
    %c0_1 = arith.constant 0 : index
    %c0_2 = arith.constant 0 : index
    %2 = vector.load %arg2[%c0_1, %c0_2] : memref<16x64xbf16, #tpu.memory_space<vmem>>, vector<16x64xbf16>
    %cst = arith.constant dense<0.000000e+00> : vector<16x64xf32>
    %3 = tpu.matmul %1, %2, %cst {dimension_numbers = #tpu.dot_dimension_numbers<[1], [0], [0], [1], [0, 0, 1, 1], [], []>} : vector<16x16xbf16>, vector<16x64xbf16>, vector<16x64xf32> -> vector<16x64xf32>
    %4 = math.cos %3 : vector<16x64xf32>
    %cst_3 = arith.constant 1.250000e-01 : f32
    %5 = vector.broadcast %cst_3 : f32 to vector<16x64xf32>
    %6 = arith.mulf %4, %5 : vector<16x64xf32>
    %7 = math.sin %3 : vector<16x64xf32>
    %cst_4 = arith.constant 1.250000e-01 : f32
    %8 = vector.broadcast %cst_4 : f32 to vector<16x64xf32>
    %9 = arith.mulf %7, %8 : vector<16x64xf32>
    %10 = tpu.concatenate %6, %9 in 1 : vector<16x64xf32>, vector<16x64xf32> -> vector<16x128xf32>
    %c0_5 = arith.constant 0 : index
    %c0_6 = arith.constant 0 : index
    %11 = vector.load %arg3[%c0_5, %c0_6] : memref<16x128xf32, #tpu.memory_space<vmem>>, vector<16x128xf32>
    tpu.vector_store %arg3[%c0_5, %c0_6], %10 {strides = array<i32>} : memref<16x128xf32, #tpu.memory_space<vmem>>, vector<16x128xf32>,
    return
  }
  func.func @transform_0(%arg0: i32) -> (i32, i32) {
    %c0_i32 = arith.constant 0 : i32
    %c0_i32_0 = arith.constant 0 : i32
    return %arg0, %c0_i32 : i32, i32
  }
  func.func @transform_1(%arg0: i32) -> (i32, i32) {
    %c0_i32 = arith.constant 0 : i32
    %c0_i32_0 = arith.constant 0 : i32
    %c0_i32_1 = arith.constant 0 : i32
    return %c0_i32, %c0_i32_0 : i32, i32
  }
  func.func @transform_2(%arg0: i32) -> (i32, i32) {
    %c0_i32 = arith.constant 0 : i32
    %c0_i32_0 = arith.constant 0 : i32
    return %arg0, %c0_i32 : i32, i32
  }
}

</mosaic_0001>

<bundles_post_ra>
// kernel: _forward_impl.2
= control target key start
LH: loop header
LB: loop body
LE: loop exit
PB: predicated region body
PF: predicated region fallthrough
CT: control target
= control target key end

     0   :  { %7 = vsyncpa [#allocation3], 0  ;;  %s752_s12 = smov [#allocation2]   ;;  %s753_s14 = smov 128   ;;  %s952_s0 = inlined_call_operand.hbm [shape: f32[16,16], index: 0, kind: input, shape index: {}]   ;;  %s953_s1 = inlined_call_operand.vmem [shape: bf16[16,64], index: 1, kind: input, shape index: {}]   ;;  %s954_s2 = inlined_call_operand.vmem [shape: f32[16,128], index: 2, kind: output, shape index: {}]  }
   0x1   :  { %s12_s11 = sshll.u32 %s952_s0, 4  ;;  %s14_s13 = sshll.u32 %s752_s12, 4  ;;  %s13_s11 = int_to_ptr.hbm [resolvable:$true] %s12_s11  ;;  %s15_s13 = int_to_ptr.vmem [resolvable:$true] %s14_s13 }
   0x2   :  { %s754_s15 = smov 8  }
   0x3   :  { %20 = dma.hbm_to_vmem [thread:$0]  %s13_s11, 256, %s15_s13, [#allocation3], %s753_s14, %s753_s14, %s754_s15  }
   0x4   :  { %750 = dma.done.wait [#allocation3], 256  }
   0x5   :  { %751 = vsyncadd [#allocation3], 4294967040  ;;  %v714_v0 = vld [vmem:[%s953_s1] sm:$0xff]  ;;  %v29_v2 = vld [vmem:[#allocation2 + $0x8] sm:$0xff]  ;;  %vm39_vm0 = vcmask 130048   ;;  %s762_s0 = smov 64  }
   0x6   :  { %v28_v1 = vld [vmem:[#allocation2] sm:$0xff]  ;;  %50 = vmatpush.bf16.msra.mxu0 %v714_v0  ;;  %v755_v23 = vmov 683565275   ;;  %v756_v25 = vmov 2475754826  }
   0x7   :  { %v30_v3 = vpack.c.bf16 %v29_v2, %v28_v1  ;;  %v757_v27 = vmov 2131351028   ;;  %v758_v29 = vmov 2102212464   ;;  %v759_v34 = vmov 920167782  }
   0x8   :  { %v760_v37 = vmov 1326507024  }
   0x9   :  { %701 = vmatmul.msk.bf16.vlgmr.msra.gmra.mxu0 %vm39_vm0, %v30_v3 }
  0x86   :  { %v784_v4 = vpop.f32.mrf.mxu0 }
  0x87   :  { %v57_v5 = vand.u32 2147483647, %v784_v4  ;;  %v60_v6 = vand.u32 2139095040, %v784_v4 }
  0x89   :  { %v61_v7 = vshrl.u32 %v60_v6, 23  ;;  %v64_v8 = vand.u32 8388607, %v57_v5 }
  0x8b   :  { %v702_v9 = vadd.s32 4294967169, %v61_v7  ;;  %v65_v10 = vor.u32 8388608, %v64_v8 }
  0x8d   :  { %v67_v11 = vadd.s32 1, %v702_v9  ;;  %v792_v13 = vshll.u32 %v65_v10, 8 }
  0x8e   :  { %v790_v12 = vpop.f32.mrf.mxu0 }
  0x8f   :  { %vm68_vm1 = vcmp.gt.s32.totalorder %v67_v11, 0  ;;  %v211_v14 = vand.u32 2147483647, %v790_v12  ;;  %v214_v16 = vand.u32 2139095040, %v790_v12  ;;  %v106_v20 = vand.u32 65535, %v792_v13 }
  0x90   :  { %v69_v15 = vsel %vm68_vm1, %v67_v11, 0  ;;  %v107_v59 = vshrl.u32 %v792_v13, 16 }
  0x91   :  { %v71_v17 = vand.u32 31, %v69_v15  ;;  %v70_v18 = vshrl.u32 %v69_v15, 5  ;;  %v215_v21 = vshrl.u32 %v214_v16, 23  ;;  %v218_v22 = vand.u32 8388607, %v211_v14 }
  0x93   :  { %v72_v19 = vsub.s32 32, %v71_v17  ;;  %v74_v24 = vshll.u32 %v755_v23, %v71_v17  ;;  %v77_v26 = vshll.u32 %v756_v25, %v71_v17  ;;  %v80_v28 = vshll.u32 %v757_v27, %v71_v17 }
  0x94   :  { %v83_v30 = vshll.u32 %v758_v29, %v71_v17  ;;  %v86_v35 = vshll.u32 %v759_v34, %v71_v17  ;;  %vm89_vm2 = vcmp.lt.s32.totalorder %v70_v18, 1  ;;  %vm90_vm3 = vcmp.lt.s32.totalorder %v70_v18, 2 }
  0x95   :  { %v75_v31 = vshrl.u32 %v756_v25, %v72_v19  ;;  %v78_v32 = vshrl.u32 %v757_v27, %v72_v19  ;;  %v81_v33 = vshrl.u32 %v758_v29, %v72_v19  ;;  %v84_v36 = vshrl.u32 %v759_v34, %v72_v19 }
  0x96   :  { %v87_v38 = vshrl.u32 %v760_v37, %v72_v19  ;;  %v705_v42 = vadd.s32 4294967169, %v215_v21  ;;  %v73_v43 = vshrl.u32 %v755_v23, %v72_v19  ;;  %vm92_vm4 = vcmp.lt.s32.totalorder %v70_v18, 4 }
  0x97   :  { %v76_v39 = vor.u32 %v75_v31, %v74_v24  ;;  %v79_v40 = vor.u32 %v78_v32, %v77_v26  ;;  %v82_v41 = vor.u32 %v81_v33, %v80_v28  ;;  %v85_v44 = vor.u32 %v84_v36, %v83_v30 }
  0x98   :  { %v88_v45 = vor.u32 %v87_v38, %v86_v35  ;;  %vm91_vm5 = vcmp.lt.s32.totalorder %v70_v18, 3  ;;  %v219_v51 = vor.u32 8388608, %v218_v22  ;;  %v221_v52 = vadd.s32 1, %v705_v42 }
  0x99   :  { %v94_v46 = vsel %vm92_vm4, %v82_v41, 2102212464  ;;  %v97_v47 = vsel %vm89_vm2, %v76_v39, %v79_v40  ;;  %v101_v48 = vsel %vm89_vm2, %v79_v40, %v82_v41  ;;  %v98_v49 = vsel %vm92_vm4, %v85_v44, 920167782 }
  0x9a   :  { %v102_v50 = vsel %vm92_vm4, %v88_v45, 1326507024  ;;  %v93_v53 = vsel %vm89_vm2, %v73_v43, %v76_v39  ;;  %v95_v54 = vsel %vm91_vm5, %v79_v40, %v94_v46  ;;  %v99_v55 = vsel %vm91_vm5, %v82_v41, %v98_v49 }
  0x9b   :  { %v103_v56 = vsel %vm91_vm5, %v85_v44, %v102_v50  ;;  %v100_v57 = vsel %vm90_vm3, %v97_v47, %v99_v55  ;;  %vm222_vm6 = vcmp.gt.s32.totalorder %v221_v52, 0  ;;  %v817_v0 = vsel %vm90_vm3, %v93_v53, %v95_v54 }
  0x9c   :  { %v104_v58 = vsel %vm90_vm3, %v101_v48, %v103_v56  ;;  %v130_v62 = vand.u32 65535, %v100_v57  ;;  %v131_v63 = vshrl.u32 %v100_v57, 16  ;;  %v223_v3 = vsel %vm222_vm6, %v221_v52, 0 }
  0x9d   :  { %v108_v60 = vand.u32 65535, %v104_v58  ;;  %v109_v61 = vshrl.u32 %v104_v58, 16  ;;  %v819_v6 = vshll.u32 %v219_v51, 8  ;;  %v225_v28 = vand.u32 31, %v223_v3 }
  0x9e   :  { %v133_v9 = vmul.u32 %v131_v63, %v106_v20  ;;  %v134_v10 = vmul.u32 %v130_v62, %v107_v59  ;;  %v132_v16 = vmul.u32 %v130_v62, %v106_v20  ;;  %v135_v17 = vmul.u32 %v131_v63, %v107_v59 }
  0x9f   :  { %v111_v1 = vmul.u32 %v109_v61, %v106_v20  ;;  %v112_v2 = vmul.u32 %v108_v60, %v107_v59  ;;  %v110_v7 = vmul.u32 %v108_v60, %v106_v20  ;;  %v113_v8 = vmul.u32 %v109_v61, %v107_v59 }
  0xa0   :  { %v136_v22 = vshll.u32 %v133_v9, 16  ;;  %v137_v24 = vshrl.u32 %v133_v9, 16  ;;  %v138_v26 = vshll.u32 %v134_v10, 16  ;;  %v761_v30 = vmov 0  }
  0xa1   :  { %v114_v11 = vshll.u32 %v111_v1, 16  ;;  %v115_v15 = vshrl.u32 %v111_v1, 16  ;;  %v116_v19 = vshll.u32 %v112_v2, 16  ;;  %v117_v21 = vshrl.u32 %v112_v2, 16 }
  0xa2   :  { %v139_v32 = vshrl.u32 %v134_v10, 16  ;;  %vm140_vm8 = vc.u32 %v132_v16, %v136_v22  ;;  %v142_v33 = vadd.s32 %v136_v22, %v132_v16  ;;  %v823_v20 = vsub.s32 32, %v225_v28 }
  0xa3   :  { %vm118_vm7 = vc.u32 %v110_v7, %v114_v11  ;;  %v120_v18 = vadd.s32 %v114_v11, %v110_v7  ;;  %v141_v36 = vsel %vm140_vm8, 1, %v761_v30  ;;  %v826_v40 = vshrl.u32 %v223_v3, 5 }
  0xa4   :  { %v119_v31 = vsel %vm118_vm7, 1, %v761_v30  ;;  %v143_v39 = vadd.s32 %v141_v36, %v135_v17  ;;  %vm144_vm10 = vc.u32 %v142_v33, %v138_v26  ;;  %v829_v43 = vadd.s32 %v142_v33, %v138_v26 }
  0xa5   :  { %v121_v35 = vadd.s32 %v119_v31, %v113_v8  ;;  %vm122_vm9 = vc.u32 %v120_v18, %v116_v19  ;;  %v145_v42 = vsel %vm144_vm10, 1, %v761_v30  ;;  %v228_v44 = vshll.u32 %v755_v23, %v225_v28 }
  0xa6   :  { %v123_v38 = vsel %vm122_vm9, 1, %v761_v30  ;;  %v147_v45 = vadd.s32 %v145_v42, %v143_v39  ;;  %v229_v46 = vshrl.u32 %v756_v25, %v823_v20  ;;  %v231_v47 = vshll.u32 %v756_v25, %v225_v28 }
  0xa7   :  { %v125_v41 = vadd.s32 %v123_v38, %v121_v35  ;;  %v232_v48 = vshrl.u32 %v757_v27, %v823_v20  ;;  %v234_v50 = vshll.u32 %v757_v27, %v225_v28  ;;  %v235_v51 = vshrl.u32 %v758_v29, %v823_v20 }
  0xa8   :  { %v237_v52 = vshll.u32 %v758_v29, %v225_v28  ;;  %v148_v53 = vadd.s32 %v147_v45, %v137_v24  ;;  %v841_v54 = vor.u32 %v229_v46, %v228_v44  ;;  %v238_v56 = vshrl.u32 %v759_v34, %v823_v20 }
  0xa9   :  { %v126_v49 = vadd.s32 %v125_v41, %v115_v15  ;;  %v843_v55 = vor.u32 %v232_v48, %v231_v47  ;;  %v236_v57 = vor.u32 %v235_v51, %v234_v50  ;;  %v240_v58 = vshll.u32 %v759_v34, %v225_v28 }
  0xaa   :  { %v241_v27 = vshrl.u32 %v760_v37, %v823_v20  ;;  %v149_v59 = vadd.s32 %v148_v53, %v139_v32  ;;  %v239_v60 = vor.u32 %v238_v56, %v237_v52  ;;  %v150_v29 = vmul.u32 %v792_v13, %v817_v0 }
  0xab   :  { %v847_v25 = vadd.s32 %v126_v49, %v117_v21  ;;  %vm243_vm12 = vcmp.lt.s32.totalorder %v826_v40, 1  ;;  %vm246_vm13 = vcmp.lt.s32.totalorder %v826_v40, 4  ;;  %v260_v37 = vand.u32 65535, %v819_v6 }
  0xac   :  { %v242_v61 = vor.u32 %v241_v27, %v240_v58  ;;  %v153_v62 = vadd.s32 1, %v149_v59  ;;  %v251_v34 = vsel %vm243_vm12, %v841_v54, %v843_v55  ;;  %vm245_vm14 = vcmp.lt.s32.totalorder %v826_v40, 3 }
  0xad   :  { %vm152_vm11 = vc.u32 %v847_v25, %v829_v43  ;;  %v252_v13 = vsel %vm246_vm13, %v239_v60, 920167782  ;;  %v255_v63 = vsel %vm243_vm12, %v843_v55, %v236_v57  ;;  %vm244_vm15 = vcmp.lt.s32.totalorder %v826_v40, 2 }
  0xae   :  { %v256_v0 = vsel %vm246_vm13, %v242_v61, 1326507024  ;;  %v154_v1 = vsel %vm152_vm11, %v153_v62, %v149_v59  ;;  %v253_v2 = vsel %vm245_vm14, %v236_v57, %v252_v13  ;;  %v261_v10 = vshrl.u32 %v819_v6, 16 }
  0xaf   :  { %v257_v3 = vsel %vm245_vm14, %v239_v60, %v256_v0  ;;  %v155_v7 = vadd.s32 %v154_v1, %v150_v29  ;;  %v254_v8 = vsel %vm244_vm15, %v251_v34, %v253_v2  ;;  %v248_v33 = vsel %vm246_vm13, %v236_v57, 2102212464 }
  0xb0   :  { %v258_v9 = vsel %vm244_vm15, %v255_v63, %v257_v3  ;;  %v284_v16 = vand.u32 65535, %v254_v8  ;;  %v285_v17 = vshrl.u32 %v254_v8, 16  ;;  %v227_v58 = vshrl.u32 %v755_v23, %v823_v20 }
  0xb1   :  { %v262_v11 = vand.u32 65535, %v258_v9  ;;  %v263_v15 = vshrl.u32 %v258_v9, 16  ;;  %v156_v19 = vadd.s32 536870912, %v155_v7  ;;  %v151_v3 = vadd.s32 %v829_v43, %v847_v25 }
  0xb2   :  { %v287_v18 = vmul.u32 %v285_v17, %v260_v37  ;;  %v288_v26 = vmul.u32 %v284_v16, %v261_v10  ;;  %v286_v41 = vmul.u32 %v284_v16, %v260_v37  ;;  %v289_v45 = vmul.u32 %v285_v17, %v261_v10 }
  0xb3   :  { %v265_v21 = vmul.u32 %v263_v15, %v260_v37  ;;  %v266_v22 = vmul.u32 %v262_v11, %v261_v10  ;;  %v881_v24 = vshrl.u32 %v156_v19, 30  ;;  %v264_v28 = vmul.u32 %v262_v11, %v260_v37 }
  0xb4   :  { %v267_v35 = vmul.u32 %v263_v15, %v261_v10  ;;  %v290_v36 = vshll.u32 %v287_v18, 16  ;;  %v292_v46 = vshll.u32 %v288_v26, 16  ;;  %v291_v61 = vshrl.u32 %v287_v18, 16 }
  0xb5   :  { %v268_v31 = vshll.u32 %v265_v21, 16  ;;  %v158_v32 = vshll.u32 %v881_v24, 30  ;;  %v270_v38 = vshll.u32 %v266_v22, 16  ;;  %v269_v52 = vshrl.u32 %v265_v21, 16 }
  0xb6   :  { %vm294_vm2 = vc.u32 %v286_v41, %v290_v36  ;;  %v296_v48 = vadd.s32 %v290_v36, %v286_v41  ;;  %v271_v27 = vshrl.u32 %v266_v22, 16  ;;  %v247_v34 = vsel %vm243_vm12, %v227_v58, %v841_v54 }
  0xb7   :  { %vm272_vm0 = vc.u32 %v264_v28, %v268_v31  ;;  %v274_v39 = vadd.s32 %v268_v31, %v264_v28  ;;  %v159_v42 = vsub.s32 %v155_v7, %v158_v32  ;;  %v295_v51 = vsel %vm294_vm2, 1, %v761_v30 }
  0xb8   :  { %v273_v44 = vsel %vm272_vm0, 1, %v761_v30  ;;  %v297_v56 = vadd.s32 %v295_v51, %v289_v45  ;;  %vm298_vm4 = vc.u32 %v296_v48, %v292_v46  ;;  %v249_v37 = vsel %vm245_vm14, %v843_v55, %v248_v33 }
  0xb9   :  { %v275_v47 = vadd.s32 %v273_v44, %v267_v35  ;;  %vm276_vm1 = vc.u32 %v274_v39, %v270_v38  ;;  %vm160_vm3 = vcmp.lt.s32.totalorder %v159_v42, 0  ;;  %v161_v49 = vsub.s32 0, %v159_v42 }
  0xba   :  { %v277_v50 = vsel %vm276_vm1, 1, %v761_v30  ;;  %v299_v59 = vsel %vm298_vm4, 1, %v761_v30  ;;  %v293_v0 = vshrl.u32 %v288_v26, 16  ;;  %v300_v23 = vadd.s32 %v296_v48, %v292_v46 }
  0xbb   :  { %v279_v53 = vadd.s32 %v277_v50, %v275_v47  ;;  %v162_v57 = vsel %vm160_vm3, %v161_v49, %v159_v42  ;;  %v301_v62 = vadd.s32 %v299_v59, %v297_v56  ;;  %v250_v30 = vsel %vm244_vm15, %v247_v34, %v249_v37 }
  0xbc   :  { %v163_v60 = vclz %v162_v57  ;;  %v304_v55 = vmul.u32 %v819_v6, %v250_v30  ;;  %vm59_vm7 = vcmp.lt.s32.totalorder %v784_v4, 0  ;;  %vm909_vm9 = vcmp.le.f32.partialorder %v57_v5, 0.7853982 }
  0xbd   :  { %v280_v29 = vadd.s32 %v279_v53, %v269_v52  ;;  %v302_v1 = vadd.s32 %v301_v62, %v291_v61  ;;  %v181_v38 = vsub.s32 4, %v881_v24  ;;  %vm200_vm11 = vweird.f32 %v784_v4 }
  0xbe   :  { %v703_v13 = vadd.s32 4294967294, %v163_v60  ;;  %vm213_vm13 = vcmp.lt.s32.totalorder %v790_v12, 0  ;;  %vm924_vm3 = vcmp.le.f32.partialorder %v211_v14, 0.7853982 }
  0xbf   :  { %v281_v63 = vadd.s32 %v280_v29, %v271_v27  ;;  %v303_v20 = vadd.s32 %v302_v1, %v293_v0  ;;  %v182_v46 = vsel %vm59_vm7, %v181_v38, %v881_v24 }
  0xc0   :  { %vm704_vm5 = vcmp.lt.s32.totalorder %v703_v13, 0  ;;  %v184_v53 = vsel %vm909_vm9, 0, %v182_v46 }
  0xc1   :  { %v166_v2 = vsel %vm704_vm5, 0, %v703_v13  ;;  %vm306_vm6 = vc.u32 %v281_v63, %v300_v23  ;;  %v307_v8 = vadd.s32 1, %v303_v20  ;;  %v305_v49 = vadd.s32 %v300_v23, %v281_v63 }
  0xc2   :  { %v167_v54 = vsub.s32 32, %v166_v2  ;;  %v171_v7 = vsub.s32 4294967266, %v166_v2  ;;  %v168_v9 = vshll.u32 %v159_v42, %v166_v2  ;;  %v511_v62 = vadd.s32 3, %v184_v53 }
  0xc3   :  { %v308_v15 = vsel %vm306_vm6, %v307_v8, %v303_v20  ;;  %v201_v63 = vand.u32 3, %v184_v53 }
  0xc4   :  { %v169_v10 = vshrl.u32 %v151_v3, %v167_v54  ;;  %v172_v11 = vadd.s32 127, %v171_v7  ;;  %v309_v16 = vadd.s32 %v308_v15, %v304_v55  ;;  %v512_v20 = vand.u32 3, %v511_v62 }
  0xc5   :  { %vm206_vm12 = vcmp.eq.s32.totalorder %v201_v63, 2  ;;  %vm202_vm14 = vcmp.lt.s32.totalorder %v201_v63, 2  ;;  %vm203_vm15 = vcmp.eq.s32.totalorder %v201_v63, 0 }
  0xc6   :  { %v170_v17 = vor.u32 %v169_v10, %v168_v9  ;;  %v173_v19 = vshll.u32 %v172_v11, 23  ;;  %v310_v40 = vadd.s32 536870912, %v309_v16  ;;  %vm514_vm0 = vcmp.eq.s32.totalorder %v512_v20, 0 }
  0xc7   :  { %vm517_vm1 = vcmp.eq.s32.totalorder %v512_v20, 2  ;;  %vm513_vm2 = vcmp.lt.s32.totalorder %v512_v20, 2 }
  0xc8   :  { %v174_v21 = vor.u32 4788187, %v173_v19  ;;  %v903_v22 = vshrl.u32 %v310_v40, 30  ;;  %v177_v26 = vcvt.s32.f32 %v170_v17 }
  0xca   :  { %v175_v18 = vand.u32 2147483647, %v174_v21  ;;  %v312_v43 = vshll.u32 %v903_v22, 30  ;;  %v335_v19 = vsub.s32 4, %v903_v22 }
  0xcc   :  { %v178_v25 = vmul.f32 %v177_v26, %v175_v18  ;;  %v313_v28 = vsub.s32 %v309_v16, %v312_v43 }
  0xce   :  { %v179_v31 = vxor.u32 2147483648, %v178_v25  ;;  %vm314_vm8 = vcmp.lt.s32.totalorder %v313_v28, 0  ;;  %v315_v6 = vsub.s32 0, %v313_v28 }
  0xd0   :  { %v180_v33 = vsel %vm59_vm7, %v179_v31, %v178_v25  ;;  %v316_v36 = vsel %vm314_vm8, %v315_v6, %v313_v28 }
  0xd1   :  { %v183_v35 = vsel %vm909_vm9, %v784_v4, %v180_v33  ;;  %v317_v41 = vclz %v316_v36 }
  0xd2   :  { %v185_v39 = vmul.f32 %v183_v35, %v183_v35 }
  0xd3   :  { %v706_v42 = vadd.s32 4294967294, %v317_v41 }
  0xd4   :  { %v186_v44 = vmul.f32 -0.001358992, %v185_v39  ;;  %v193_v45 = vmul.f32 -0.00019511016, %v185_v39 }
  0xd5   :  { %vm707_vm10 = vcmp.lt.s32.totalorder %v706_v42, 0 }
  0xd6   :  { %v187_v5 = vadd.f32 0.041655596, %v186_v44  ;;  %v194_v47 = vadd.f32 0.008332121, %v193_v45  ;;  %v320_v48 = vsel %vm707_vm10, 0, %v706_v42  ;;  %vm354_vm10 = vweird.f32 %v790_v12 }
  0xd7   :  { %v321_v50 = vsub.s32 32, %v320_v48  ;;  %v325_v51 = vsub.s32 4294967266, %v320_v48  ;;  %v322_v57 = vshll.u32 %v313_v28, %v320_v48  ;;  %v336_v28 = vsel %vm213_vm13, %v335_v19, %v903_v22 }
  0xd8   :  { %v188_v52 = vmul.f32 %v187_v5, %v185_v39  ;;  %v195_v56 = vmul.f32 %v194_v47, %v185_v39  ;;  %v338_v32 = vsel %vm924_vm3, 0, %v336_v28 }
  0xd9   :  { %v323_v58 = vshrl.u32 %v305_v49, %v321_v50  ;;  %v326_v27 = vadd.s32 127, %v325_v51  ;;  %v666_v38 = vadd.s32 3, %v338_v32  ;;  %v355_v42 = vand.u32 3, %v338_v32 }
  0xda   :  { %v189_v59 = vadd.f32 -0.4999988, %v188_v52  ;;  %v196_v60 = vadd.f32 -0.16666654, %v195_v56 }
  0xdb   :  { %v324_v29 = vor.u32 %v323_v58, %v322_v57  ;;  %v327_v61 = vshll.u32 %v326_v27, 23  ;;  %v667_v46 = vand.u32 3, %v666_v38  ;;  %vm360_vm4 = vcmp.eq.s32.totalorder %v355_v42, 2 }
  0xdc   :  { %v190_v24 = vmul.f32 %v189_v59, %v185_v39  ;;  %v197_v34 = vmul.f32 %v196_v60, %v185_v39  ;;  %vm356_vm5 = vcmp.lt.s32.totalorder %v355_v42, 2  ;;  %vm357_vm6 = vcmp.eq.s32.totalorder %v355_v42, 0 }
  0xdd   :  { %v328_v37 = vor.u32 4788187, %v327_v61  ;;  %v331_v23 = vcvt.s32.f32 %v324_v29  ;;  %vm669_vm7 = vcmp.eq.s32.totalorder %v667_v46, 0  ;;  %vm672_vm8 = vcmp.eq.s32.totalorder %v667_v46, 2 }
  0xde   :  { %v191_v13 = vadd.f32 1.0, %v190_v24  ;;  %v198_v0 = vadd.f32 1.0, %v197_v34  ;;  %vm668_vm9 = vcmp.lt.s32.totalorder %v667_v46, 2 }
  0xdf   :  { %v329_v1 = vand.u32 2147483647, %v328_v37 }
  0xe0   :  { %v207_v30 = vxor.u32 2147483648, %v191_v13  ;;  %v199_v2 = vmul.f32 %v198_v0, %v183_v35 }
  0xe1   :  { %v332_v3 = vmul.f32 %v331_v23, %v329_v1 }
  0xe2   :  { %v204_v54 = vxor.u32 2147483648, %v199_v2  ;;  %v208_v7 = vsel %vm206_vm12, %v207_v30, %v199_v2  ;;  %v519_v9 = vsel %vm517_vm1, %v207_v30, %v199_v2 }
  0xe3   :  { %v333_v8 = vxor.u32 2147483648, %v332_v3 }
  0xe4   :  { %v516_v55 = vsel %vm514_vm0, %v191_v13, %v204_v54  ;;  %v205_v10 = vsel %vm203_vm15, %v191_v13, %v204_v54 }
  0xe5   :  { %v334_v15 = vsel %vm213_vm13, %v333_v8, %v332_v3  ;;  %v520_v16 = vsel %vm513_vm2, %v516_v55, %v519_v9  ;;  %v209_v17 = vsel %vm202_vm14, %v205_v10, %v208_v7 }
  0xe6   :  { %v337_v40 = vsel %vm924_vm3, %v790_v12, %v334_v15  ;;  %v521_v21 = vsel %vm200_vm11, nan, %v520_v16  ;;  %v210_v14 = vsel %vm200_vm11, nan, %v209_v17  ;;  %vm687_vm11 = vcmask 523264  }
  0xe7   :  { %v339_v18 = vmul.f32 %v337_v40, %v337_v40  ;;  %v677_v26 = vmul.f32 0.125, %v521_v21  ;;  %v365_v27 = vmul.f32 0.125, %v210_v14 }
  0xe9   :  { %v347_v43 = vmul.f32 -0.00019511016, %v339_v18  ;;  %681 = vrot.lane.b32.xlu0 %v677_v26, %s762_s0  ;;  %v340_v25 = vmul.f32 -0.001358992, %v339_v18 }
  0xeb   :  { %v348_v31 = vadd.f32 0.008332121, %v347_v43  ;;  %v341_v6 = vadd.f32 0.041655596, %v340_v25 }
  0xed   :  { %v349_v33 = vmul.f32 %v348_v31, %v339_v18  ;;  %v342_v35 = vmul.f32 %v341_v6, %v339_v18 }
  0xef   :  { %v350_v4 = vadd.f32 -0.16666654, %v349_v33  ;;  %v343_v36 = vadd.f32 -0.4999988, %v342_v35 }
  0xf1   :  { %v351_v39 = vmul.f32 %v350_v4, %v339_v18  ;;  %v344_v41 = vmul.f32 %v343_v36, %v339_v18 }
  0xf3   :  { %v352_v44 = vadd.f32 1.0, %v351_v39  ;;  %v345_v45 = vadd.f32 1.0, %v344_v41 }
  0xf5   :  { %v353_v5 = vmul.f32 %v352_v44, %v337_v40  ;;  %v361_v47 = vxor.u32 2147483648, %v345_v45 }
  0xf7   :  { %v358_v22 = vxor.u32 2147483648, %v353_v5  ;;  %v362_v48 = vsel %vm360_vm4, %v361_v47, %v353_v5  ;;  %v674_v50 = vsel %vm672_vm8, %v361_v47, %v353_v5 }
  0xf9   :  { %v671_v49 = vsel %vm669_vm7, %v345_v45, %v358_v22  ;;  %v359_v51 = vsel %vm357_vm6, %v345_v45, %v358_v22 }
  0xfa   :  { %v675_v52 = vsel %vm668_vm9, %v671_v49, %v674_v50  ;;  %v363_v53 = vsel %vm356_vm5, %v359_v51, %v362_v48 }
  0xfb   :  { %v676_v56 = vsel %vm354_vm10, nan, %v675_v52  ;;  %v364_v57 = vsel %vm354_vm10, nan, %v363_v53 }
  0xfc   :  { %v678_v58 = vmul.f32 0.125, %v676_v56  ;;  %v366_v29 = vmul.f32 0.125, %v364_v57 }
  0xfe   :  { %683 = vrot.lane.b32.xlu0 %v678_v58, %s762_s0 }
 0x15b   :  { %v682_v59 = vpop.permute.xlu0 %681 }
 0x15c   :  { %v688_v60 = vsel %vm687_vm11, %v365_v27, %v682_v59 }
 0x15d   :  { %690 = vst [vmem:[%s954_s2] sm:$0xff] %v688_v60 }
 0x170   :  { %v684_v61 = vpop.permute.xlu0 %683 }
 0x171   :  { %v689_v24 = vsel %vm687_vm11, %v366_v29, %v684_v61 }
 0x172   :  { %691 = vst [vmem:[%s954_s2 + $0x8] sm:$0xff] %v689_v24 }
 0x173   :  { %696 = vsyncpa [#allocation3], 1 }

// kernel: _forward_impl.3
= control target key start
LH: loop header
LB: loop body
LE: loop exit
PB: predicated region body
PF: predicated region fallthrough
CT: control target
= control target key end

     0   :  { %v926_v30 = vmov 683565275   ;;  %v927_v32 = vmov 2475754826   ;;  %v928_v36 = vmov 2131351028   ;;  %s1174_s1 = inlined_call_operand.vmem [shape: bf16[128,64], index: 1, kind: input, shape index: {}]   ;;  %s1175_s0 = inlined_call_operand.vmem [shape: f32[16,128], index: 0, kind: input, shape index: {}]   ;;  %s1176_s2 = inlined_call_operand.vmem [shape: bf16[128,128], index: 2, kind: input, shape index: {}]   ;;  %s1177_s3 = inlined_call_operand.vmem [shape: f32[1,128], index: 3, kind: input, shape index: {}]   ;;  %s1178_s4 = inlined_call_operand.vmem [shape: f32[16,128], index: 4, kind: output, shape index: {}]  }
   0x1   :  { %v903_v0 = vld [vmem:[%s1174_s1 + $0x38] sm:$0xff]  ;;  %v902_v1 = vld [vmem:[%s1174_s1 + $0x30] sm:$0xff]  ;;  %v901_v2 = vld [vmem:[%s1174_s1 + $0x28] sm:$0xff]  ;;  %v929_v39 = vmov 2102212464   ;;  %s933_s21 = smov 64  }
   0x2   :  { %84 = vmatpush.bf16.msra.mxu0 %v903_v0  ;;  %v900_v3 = vld [vmem:[%s1174_s1 + $0x20] sm:$0xff]  ;;  %v899_v4 = vld [vmem:[%s1174_s1 + $0x18] sm:$0xff]  ;;  %v898_v5 = vld [vmem:[%s1174_s1 + $0x10] sm:$0xff]  ;;  %v930_v42 = vmov 920167782  }
   0x3   :  { %v897_v6 = vld [vmem:[%s1174_s1 + $0x8] sm:$0xff]  ;;  %v896_v7 = vld [vmem:[%s1174_s1] sm:$0xff]  ;;  %v931_v45 = vmov 1326507024  }
   0x4   :  { %v17_v8 = vld [vmem:[%s1175_s0] sm:$0xff]  ;;  %v18_v9 = vld [vmem:[%s1175_s0 + $0x8] sm:$0xff] }
   0x5   :  { %v19_v10 = vpack.c.bf16 %v18_v9, %v17_v8 }
   0x6   :  { %85 = vmatpush.bf16.msra.mxu0 %v902_v1 }
   0xa   :  { %86 = vmatpush.bf16.msra.mxu0 %v901_v2 }
   0xe   :  { %87 = vmatpush.bf16.msra.mxu0 %v900_v3 }
  0x12   :  { %88 = vmatpush.bf16.msra.mxu0 %v899_v4 }
  0x16   :  { %89 = vmatpush.bf16.msra.mxu0 %v898_v5 }
  0x1a   :  { %90 = vmatpush.bf16.msra.mxu0 %v897_v6 }
  0x1e   :  { %91 = vmatpush.bf16.msra.mxu0 %v896_v7 }
  0x21   :  { %92 = vmatmul.bf16.vlgmr.msra.gmra.mxu0 %v19_v10 }
  0x9e   :  { %v989_v11 = vpop.f32.mrf.mxu0 }
  0x9f   :  { %v98_v12 = vand.u32 2147483647, %v989_v11  ;;  %v101_v13 = vand.u32 2139095040, %v989_v11 }
  0xa1   :  { %v102_v14 = vshrl.u32 %v101_v13, 23  ;;  %v105_v15 = vand.u32 8388607, %v98_v12 }
  0xa3   :  { %v852_v16 = vadd.s32 4294967169, %v102_v14  ;;  %v106_v17 = vor.u32 8388608, %v105_v15 }
  0xa5   :  { %v108_v18 = vadd.s32 1, %v852_v16  ;;  %v997_v20 = vshll.u32 %v106_v17, 8 }
  0xa6   :  { %v995_v19 = vpop.f32.mrf.mxu0 }
  0xa7   :  { %vm109_vm0 = vcmp.gt.s32.totalorder %v108_v18, 0  ;;  %v252_v22 = vand.u32 2147483647, %v995_v19  ;;  %v255_v23 = vand.u32 2139095040, %v995_v19  ;;  %v147_v26 = vand.u32 65535, %v997_v20 }
  0xa8   :  { %v110_v21 = vsel %vm109_vm0, %v108_v18, 0  ;;  %v148_v27 = vshrl.u32 %v997_v20, 16 }
  0xa9   :  { %v112_v24 = vand.u32 31, %v110_v21  ;;  %v256_v28 = vshrl.u32 %v255_v23, 23  ;;  %v111_v29 = vshrl.u32 %v110_v21, 5  ;;  %v1007_v34 = vand.u32 8388607, %v252_v22 }
  0xab   :  { %v113_v25 = vsub.s32 32, %v112_v24  ;;  %v115_v31 = vshll.u32 %v926_v30, %v112_v24  ;;  %v118_v33 = vshll.u32 %v927_v32, %v112_v24  ;;  %v121_v38 = vshll.u32 %v928_v36, %v112_v24 }
  0xac   :  { %v124_v41 = vshll.u32 %v929_v39, %v112_v24  ;;  %v127_v44 = vshll.u32 %v930_v42, %v112_v24  ;;  %v855_v50 = vadd.s32 4294967169, %v256_v28  ;;  %vm130_vm1 = vcmp.lt.s32.totalorder %v111_v29, 1 }
  0xad   :  { %v116_v35 = vshrl.u32 %v927_v32, %v113_v25  ;;  %v119_v37 = vshrl.u32 %v928_v36, %v113_v25  ;;  %v122_v40 = vshrl.u32 %v929_v39, %v113_v25  ;;  %v125_v43 = vshrl.u32 %v930_v42, %v113_v25 }
  0xae   :  { %v128_v46 = vshrl.u32 %v931_v45, %v113_v25  ;;  %vm133_vm2 = vcmp.lt.s32.totalorder %v111_v29, 4  ;;  %v114_v53 = vshrl.u32 %v926_v30, %v113_v25  ;;  %vm132_vm3 = vcmp.lt.s32.totalorder %v111_v29, 3 }
  0xaf   :  { %v117_v47 = vor.u32 %v116_v35, %v115_v31  ;;  %v120_v48 = vor.u32 %v119_v37, %v118_v33  ;;  %v123_v49 = vor.u32 %v122_v40, %v121_v38  ;;  %v126_v51 = vor.u32 %v125_v43, %v124_v41 }
  0xb0   :  { %v129_v52 = vor.u32 %v128_v46, %v127_v44  ;;  %v262_v59 = vadd.s32 1, %v855_v50  ;;  %vm131_vm4 = vcmp.lt.s32.totalorder %v111_v29, 2  ;;  %v260_v6 = vor.u32 8388608, %v1007_v34 }
  0xb1   :  { %v135_v54 = vsel %vm133_vm2, %v123_v49, 2102212464  ;;  %v138_v55 = vsel %vm130_vm1, %v117_v47, %v120_v48  ;;  %v142_v56 = vsel %vm130_vm1, %v120_v48, %v123_v49  ;;  %v139_v57 = vsel %vm133_vm2, %v126_v51, 920167782 }
  0xb2   :  { %v143_v58 = vsel %vm133_vm2, %v129_v52, 1326507024  ;;  %v134_v60 = vsel %vm130_vm1, %v114_v53, %v117_v47  ;;  %v140_v61 = vsel %vm132_vm3, %v123_v49, %v139_v57  ;;  %v136_v63 = vsel %vm132_vm3, %v120_v48, %v135_v54 }
  0xb3   :  { %v144_v62 = vsel %vm132_vm3, %v126_v51, %v143_v58  ;;  %v141_v0 = vsel %vm131_vm4, %v138_v55, %v140_v61  ;;  %vm263_vm5 = vcmp.gt.s32.totalorder %v262_v59, 0  ;;  %v1019_v7 = vsel %vm131_vm4, %v134_v60, %v136_v63 }
  0xb4   :  { %v145_v1 = vsel %vm131_vm4, %v142_v56, %v144_v62  ;;  %v171_v4 = vand.u32 65535, %v141_v0  ;;  %v172_v5 = vshrl.u32 %v141_v0, 16  ;;  %v264_v10 = vsel %vm263_vm5, %v262_v59, 0 }
  0xb5   :  { %v149_v2 = vand.u32 65535, %v145_v1  ;;  %v150_v3 = vshrl.u32 %v145_v1, 16  ;;  %v266_v34 = vand.u32 31, %v264_v10  ;;  %v932_v35 = vmov 0  }
  0xb6   :  { %v174_v15 = vmul.u32 %v172_v5, %v147_v26  ;;  %v175_v16 = vmul.u32 %v171_v4, %v148_v27  ;;  %v173_v21 = vmul.u32 %v171_v4, %v147_v26  ;;  %v176_v23 = vmul.u32 %v172_v5, %v148_v27 }
  0xb7   :  { %v152_v8 = vmul.u32 %v150_v3, %v147_v26  ;;  %v153_v9 = vmul.u32 %v149_v2, %v148_v27  ;;  %v151_v13 = vmul.u32 %v149_v2, %v147_v26  ;;  %v154_v14 = vmul.u32 %v150_v3, %v148_v27 }
  0xb8   :  { %v177_v28 = vshll.u32 %v174_v15, 16  ;;  %v178_v29 = vshrl.u32 %v174_v15, 16  ;;  %v179_v33 = vshll.u32 %v175_v16, 16  ;;  %v180_v38 = vshrl.u32 %v175_v16, 16 }
  0xb9   :  { %v155_v17 = vshll.u32 %v152_v8, 16  ;;  %v156_v18 = vshrl.u32 %v152_v8, 16  ;;  %v157_v24 = vshll.u32 %v153_v9, 16  ;;  %v158_v25 = vshrl.u32 %v153_v9, 16 }
  0xba   :  { %vm181_vm7 = vc.u32 %v173_v21, %v177_v28  ;;  %v183_v40 = vadd.s32 %v177_v28, %v173_v21  ;;  %v1023_v26 = vsub.s32 32, %v266_v34  ;;  %v1026_v46 = vshrl.u32 %v264_v10, 5 }
  0xbb   :  { %vm159_vm6 = vc.u32 %v151_v13, %v155_v17  ;;  %v161_v31 = vadd.s32 %v155_v17, %v151_v13  ;;  %v182_v43 = vsel %vm181_vm7, 1, %v932_v35  ;;  %v269_v50 = vshll.u32 %v926_v30, %v266_v34 }
  0xbc   :  { %v160_v37 = vsel %vm159_vm6, 1, %v932_v35  ;;  %v184_v44 = vadd.s32 %v182_v43, %v176_v23  ;;  %vm185_vm9 = vc.u32 %v183_v40, %v179_v33  ;;  %v1029_v49 = vadd.s32 %v183_v40, %v179_v33 }
  0xbd   :  { %v162_v41 = vadd.s32 %v160_v37, %v154_v14  ;;  %vm163_vm8 = vc.u32 %v161_v31, %v157_v24  ;;  %v186_v48 = vsel %vm185_vm9, 1, %v932_v35  ;;  %v270_v52 = vshrl.u32 %v927_v32, %v1023_v26 }
  0xbe   :  { %v164_v27 = vsel %vm163_vm8, 1, %v932_v35  ;;  %v188_v51 = vadd.s32 %v186_v48, %v184_v44  ;;  %v272_v53 = vshll.u32 %v927_v32, %v266_v34  ;;  %v273_v54 = vshrl.u32 %v928_v36, %v1023_v26 }
  0xbf   :  { %v166_v47 = vadd.s32 %v164_v27, %v162_v41  ;;  %v275_v56 = vshll.u32 %v928_v36, %v266_v34  ;;  %v276_v57 = vshrl.u32 %v929_v39, %v1023_v26  ;;  %v278_v58 = vshll.u32 %v929_v39, %v266_v34 }
  0xc0   :  { %v189_v59 = vadd.s32 %v188_v51, %v178_v29  ;;  %v1041_v60 = vor.u32 %v270_v52, %v269_v50  ;;  %v1043_v61 = vor.u32 %v273_v54, %v272_v53  ;;  %v279_v62 = vshrl.u32 %v930_v42, %v1023_v26 }
  0xc1   :  { %v167_v55 = vadd.s32 %v166_v47, %v156_v18  ;;  %v277_v63 = vor.u32 %v276_v57, %v275_v56  ;;  %v281_v0 = vshll.u32 %v930_v42, %v266_v34  ;;  %v282_v36 = vshrl.u32 %v931_v45, %v1023_v26 }
  0xc2   :  { %v190_v1 = vadd.s32 %v189_v59, %v180_v38  ;;  %v280_v2 = vor.u32 %v279_v62, %v278_v58  ;;  %vm284_vm11 = vcmp.lt.s32.totalorder %v1026_v46, 1  ;;  %v1055_v3 = vshll.u32 %v260_v6, 8 }
  0xc3   :  { %v1047_v32 = vadd.s32 %v167_v55, %v158_v25  ;;  %v283_v39 = vor.u32 %v282_v36, %v281_v0  ;;  %v191_v4 = vmul.u32 %v997_v20, %v1019_v7  ;;  %vm287_vm12 = vcmp.lt.s32.totalorder %v1026_v46, 4 }
  0xc4   :  { %v194_v5 = vadd.s32 1, %v190_v1  ;;  %v292_v42 = vsel %vm284_vm11, %v1041_v60, %v1043_v61  ;;  %vm286_vm13 = vcmp.lt.s32.totalorder %v1026_v46, 3  ;;  %v293_v45 = vsel %vm287_vm12, %v280_v2, 920167782 }
  0xc5   :  { %vm193_vm10 = vc.u32 %v1047_v32, %v1029_v49  ;;  %v296_v6 = vsel %vm284_vm11, %v1043_v61, %v277_v63  ;;  %v297_v20 = vsel %vm287_vm12, %v283_v39, 1326507024  ;;  %vm285_vm14 = vcmp.lt.s32.totalorder %v1026_v46, 2 }
  0xc6   :  { %v195_v7 = vsel %vm193_vm10, %v194_v5, %v190_v1  ;;  %v294_v8 = vsel %vm286_vm13, %v277_v63, %v293_v45  ;;  %v298_v9 = vsel %vm286_vm13, %v280_v2, %v297_v20  ;;  %v301_v15 = vand.u32 65535, %v1055_v3 }
  0xc7   :  { %v196_v10 = vadd.s32 %v195_v7, %v191_v4  ;;  %v295_v13 = vsel %vm285_vm14, %v292_v42, %v294_v8  ;;  %v299_v14 = vsel %vm285_vm14, %v296_v6, %v298_v9  ;;  %v302_v16 = vshrl.u32 %v1055_v3, 16 }
  0xc8   :  { %v303_v17 = vand.u32 65535, %v299_v14  ;;  %v304_v18 = vshrl.u32 %v299_v14, 16  ;;  %v326_v21 = vshrl.u32 %v295_v13, 16  ;;  %v325_v24 = vand.u32 65535, %v295_v13 }
  0xc9   :  { %v197_v23 = vadd.s32 536870912, %v196_v10  ;;  %v289_v36 = vsel %vm287_vm12, %v277_v63, 2102212464  ;;  %v268_v2 = vshrl.u32 %v926_v30, %v1023_v26  ;;  %v192_v30 = vadd.s32 %v1029_v49, %v1047_v32 }
  0xca   :  { %v306_v25 = vmul.u32 %v304_v18, %v301_v15  ;;  %v307_v28 = vmul.u32 %v303_v17, %v302_v16  ;;  %v328_v31 = vmul.u32 %v326_v21, %v301_v15  ;;  %v305_v33 = vmul.u32 %v303_v17, %v301_v15 }
  0xcb   :  { %v1083_v29 = vshrl.u32 %v197_v23, 30  ;;  %v308_v38 = vmul.u32 %v304_v18, %v302_v16  ;;  %v327_v40 = vmul.u32 %v325_v24, %v301_v15  ;;  %v329_v44 = vmul.u32 %v325_v24, %v302_v16 }
  0xcc   :  { %v309_v34 = vshll.u32 %v306_v25, 16  ;;  %v331_v41 = vshll.u32 %v328_v31, 16  ;;  %v311_v43 = vshll.u32 %v307_v28, 16  ;;  %v310_v50 = vshrl.u32 %v306_v25, 16 }
  0xcd   :  { %v199_v37 = vshll.u32 %v1083_v29, 30  ;;  %v330_v54 = vmul.u32 %v326_v21, %v302_v16  ;;  %v333_v56 = vshll.u32 %v329_v44, 16  ;;  %v312_v39 = vshrl.u32 %v307_v28, 16 }
  0xce   :  { %vm313_vm15 = vc.u32 %v305_v33, %v309_v34  ;;  %v315_v27 = vadd.s32 %v309_v34, %v305_v33  ;;  %vm335_vm1 = vc.u32 %v327_v40, %v331_v41  ;;  %v337_v58 = vadd.s32 %v331_v41, %v327_v40 }
  0xcf   :  { %v200_v47 = vsub.s32 %v196_v10, %v199_v37  ;;  %v314_v48 = vsel %vm313_vm15, 1, %v932_v35  ;;  %v336_v57 = vsel %vm335_vm1, 1, %v932_v35  ;;  %v332_v42 = vshrl.u32 %v328_v31, 16 }
  0xd0   :  { %v316_v51 = vadd.s32 %v314_v48, %v308_v38  ;;  %vm317_vm0 = vc.u32 %v315_v27, %v311_v43  ;;  %v338_v62 = vadd.s32 %v336_v57, %v330_v54  ;;  %vm339_vm3 = vc.u32 %v337_v58, %v333_v56 }
  0xd1   :  { %vm201_vm2 = vcmp.lt.s32.totalorder %v200_v47, 0  ;;  %v202_v52 = vsub.s32 0, %v200_v47  ;;  %v318_v53 = vsel %vm317_vm0, 1, %v932_v35  ;;  %v340_v4 = vsel %vm339_vm3, 1, %v932_v35 }
  0xd2   :  { %v320_v55 = vadd.s32 %v318_v53, %v316_v51  ;;  %v342_v45 = vadd.s32 %v340_v4, %v338_v62  ;;  %v288_v6 = vsel %vm284_vm11, %v268_v2, %v1041_v60  ;;  %v290_v20 = vsel %vm286_vm13, %v1043_v61, %v289_v36 }
  0xd3   :  { %v203_v59 = vsel %vm201_vm2, %v202_v52, %v200_v47  ;;  %v334_v7 = vshrl.u32 %v329_v44, 16  ;;  %v341_v35 = vadd.s32 %v337_v58, %v333_v56  ;;  %v291_v13 = vsel %vm285_vm14, %v288_v6, %v290_v20 }
  0xd4   :  { %v204_v0 = vclz %v203_v59  ;;  %v321_v1 = vadd.s32 %v320_v55, %v310_v50  ;;  %v343_v8 = vadd.s32 %v342_v45, %v332_v42  ;;  %v345_v17 = vmul.u32 %v1055_v3, %v291_v13 }
  0xd5   :  { %vm100_vm6 = vcmp.lt.s32.totalorder %v989_v11, 0  ;;  %vm1111_vm7 = vcmp.le.f32.partialorder %v98_v12, 0.7853982  ;;  %v222_v44 = vsub.s32 4, %v1083_v29  ;;  %vm241_vm13 = vweird.f32 %v989_v11 }
  0xd6   :  { %v853_v5 = vadd.s32 4294967294, %v204_v0  ;;  %v322_v63 = vadd.s32 %v321_v1, %v312_v39  ;;  %v344_v14 = vadd.s32 %v343_v8, %v334_v7  ;;  %vm254_vm14 = vcmp.lt.s32.totalorder %v995_v19, 0 }
  0xd7   :  { %v223_v53 = vsel %vm100_vm6, %v222_v44, %v1083_v29  ;;  %vm253_vm15 = vcmp.le.f32.partialorder %v252_v22, 0.7853982  ;;  %v908_v22 = vld [vmem:[%s1176_s2 + $0x20] sm:$0xff] }
  0xd8   :  { %vm854_vm4 = vcmp.lt.s32.totalorder %v853_v5, 0  ;;  %vm347_vm5 = vc.u32 %v322_v63, %v341_v35  ;;  %v348_v61 = vadd.s32 1, %v344_v14  ;;  %v346_v58 = vadd.s32 %v341_v35, %v322_v63 }
  0xd9   :  { %v207_v26 = vsel %vm854_vm4, 0, %v853_v5  ;;  %v225_v0 = vsel %vm1111_vm7, 0, %v223_v53 }
  0xda   :  { %v208_v9 = vsub.s32 32, %v207_v26  ;;  %v212_v10 = vsub.s32 4294967266, %v207_v26  ;;  %v209_v60 = vshll.u32 %v200_v47, %v207_v26  ;;  %v349_v23 = vsel %vm347_vm5, %v348_v61, %v344_v14 }
  0xdb   :  { %v350_v24 = vadd.s32 %v349_v23, %v345_v17  ;;  %v242_v45 = vand.u32 3, %v225_v0  ;;  %v909_v23 = vld [vmem:[%s1176_s2 + $0x28] sm:$0xff] }
  0xdc   :  { %v210_v15 = vshrl.u32 %v192_v30, %v208_v9  ;;  %v213_v16 = vadd.s32 127, %v212_v10  ;;  %v911_v10 = vld [vmem:[%s1176_s2 + $0x38] sm:$0xff] }
  0xdd   :  { %v351_v32 = vadd.s32 536870912, %v350_v24  ;;  %vm247_vm10 = vcmp.eq.s32.totalorder %v242_v45, 2  ;;  %vm244_vm11 = vcmp.eq.s32.totalorder %v242_v45, 0  ;;  %vm243_vm12 = vcmp.lt.s32.totalorder %v242_v45, 2  ;;  %800 = vmatpush.bf16.msra.mxu1 %v911_v10 }
  0xde   :  { %v211_v18 = vor.u32 %v210_v15, %v209_v60  ;;  %v214_v21 = vshll.u32 %v213_v16, 23  ;;  %v910_v15 = vld [vmem:[%s1176_s2 + $0x30] sm:$0xff] }
  0xdf   :  { %v1105_v31 = vshrl.u32 %v351_v32, 30 }
  0xe0   :  { %v215_v49 = vor.u32 4788187, %v214_v21  ;;  %v218_v28 = vcvt.s32.f32 %v211_v18 }
  0xe1   :  { %v353_v33 = vshll.u32 %v1105_v31, 30  ;;  %v376_v18 = vsub.s32 4, %v1105_v31  ;;  %801 = vmatpush.bf16.msra.mxu1 %v910_v15 }
  0xe2   :  { %v216_v25 = vand.u32 2147483647, %v215_v49 }
  0xe3   :  { %v354_v37 = vsub.s32 %v350_v24, %v353_v33 }
  0xe4   :  { %v219_v46 = vmul.f32 %v218_v28, %v216_v25  ;;  %v377_v25 = vsel %vm254_vm14, %v376_v18, %v1105_v31  ;;  %v552_v28 = vadd.s32 3, %v225_v0 }
  0xe5   :  { %vm355_vm8 = vcmp.lt.s32.totalorder %v354_v37, 0  ;;  %v356_v41 = vsub.s32 0, %v354_v37  ;;  %802 = vmatpush.bf16.msra.mxu1 %v909_v23 }
  0xe6   :  { %v220_v34 = vxor.u32 2147483648, %v219_v46 }
  0xe7   :  { %v357_v27 = vsel %vm355_vm8, %v356_v41, %v354_v37 }
  0xe8   :  { %v221_v38 = vsel %vm100_vm6, %v220_v34, %v219_v46  ;;  %v358_v48 = vclz %v357_v27  ;;  %v379_v34 = vsel %vm253_vm15, 0, %v377_v25 }
  0xe9   :  { %v224_v40 = vsel %vm1111_vm7, %v989_v11, %v221_v38  ;;  %v553_v38 = vand.u32 3, %v552_v28  ;;  %803 = vmatpush.bf16.msra.mxu1 %v908_v22  ;;  %v707_v31 = vadd.s32 3, %v379_v34  ;;  %v904_v11 = vld [vmem:[%s1176_s2] sm:$0xff] }
  0xea   :  { %v226_v43 = vmul.f32 %v224_v40, %v224_v40  ;;  %v856_v51 = vadd.s32 4294967294, %v358_v48  ;;  %v906_v48 = vld [vmem:[%s1176_s2 + $0x10] sm:$0xff] }
  0xeb   :  { %vm555_vm0 = vcmp.eq.s32.totalorder %v553_v38, 0  ;;  %vm558_vm1 = vcmp.eq.s32.totalorder %v553_v38, 2  ;;  %vm554_vm2 = vcmp.lt.s32.totalorder %v553_v38, 2 }
  0xec   :  { %v234_v47 = vmul.f32 -0.00019511016, %v226_v43  ;;  %v227_v50 = vmul.f32 -0.001358992, %v226_v43  ;;  %vm857_vm9 = vcmp.lt.s32.totalorder %v856_v51, 0 }
  0xed   :  { %v361_v56 = vsel %vm857_vm9, 0, %v856_v51  ;;  %vm395_vm9 = vweird.f32 %v995_v19 }
  0xee   :  { %v235_v12 = vadd.f32 0.008332121, %v234_v47  ;;  %v228_v52 = vadd.f32 0.041655596, %v227_v50  ;;  %v362_v59 = vsub.s32 32, %v361_v56  ;;  %v366_v62 = vsub.s32 4294967266, %v361_v56 }
  0xef   :  { %v363_v2 = vshll.u32 %v354_v37, %v361_v56  ;;  %v396_v47 = vand.u32 3, %v379_v34 }
  0xf0   :  { %v236_v54 = vmul.f32 %v235_v12, %v226_v43  ;;  %v229_v55 = vmul.f32 %v228_v52, %v226_v43  ;;  %v364_v39 = vshrl.u32 %v346_v58, %v362_v59  ;;  %v367_v4 = vadd.s32 127, %v366_v62 }
  0xf1   :  { %v708_v52 = vand.u32 3, %v707_v31  ;;  %vm401_vm3 = vcmp.eq.s32.totalorder %v396_v47, 2  ;;  %vm397_vm4 = vcmp.lt.s32.totalorder %v396_v47, 2  ;;  %vm398_vm5 = vcmp.eq.s32.totalorder %v396_v47, 0 }
  0xf2   :  { %v237_v57 = vadd.f32 -0.16666654, %v236_v54  ;;  %v230_v36 = vadd.f32 -0.4999988, %v229_v55  ;;  %v365_v29 = vor.u32 %v364_v39, %v363_v2  ;;  %v368_v6 = vshll.u32 %v367_v4, 23 }
  0xf3   :  { %vm709_vm6 = vcmp.lt.s32.totalorder %v708_v52, 2  ;;  %vm710_vm7 = vcmp.eq.s32.totalorder %v708_v52, 0  ;;  %vm713_vm8 = vcmp.eq.s32.totalorder %v708_v52, 2 }
  0xf4   :  { %v238_v1 = vmul.f32 %v237_v57, %v226_v43  ;;  %v231_v5 = vmul.f32 %v230_v36, %v226_v43  ;;  %v369_v8 = vor.u32 4788187, %v368_v6  ;;  %v372_v26 = vcvt.s32.f32 %v365_v29  ;;  %v905_v57 = vld [vmem:[%s1176_s2 + $0x8] sm:$0xff] }
  0xf6   :  { %v239_v42 = vadd.f32 1.0, %v238_v1  ;;  %v232_v20 = vadd.f32 1.0, %v231_v5  ;;  %v370_v63 = vand.u32 2147483647, %v369_v8 }
  0xf8   :  { %v240_v7 = vmul.f32 %v239_v42, %v224_v40  ;;  %v248_v30 = vxor.u32 2147483648, %v232_v20  ;;  %v373_v13 = vmul.f32 %v372_v26, %v370_v63  ;;  %v907_v40 = vld [vmem:[%s1176_s2 + $0x18] sm:$0xff] }
  0xf9   :  { %804 = vmatpush.bf16.msra.mxu1 %v907_v40 }
  0xfa   :  { %v245_v35 = vxor.u32 2147483648, %v240_v7  ;;  %v249_v9 = vsel %vm247_vm10, %v248_v30, %v240_v7  ;;  %v374_v16 = vxor.u32 2147483648, %v373_v13  ;;  %v560_v55 = vsel %vm558_vm1, %v248_v30, %v240_v7 }
  0xfb   :  { %vm728_vm10 = vcmask 523264  }
  0xfc   :  { %v246_v14 = vsel %vm244_vm11, %v232_v20, %v245_v35  ;;  %v375_v17 = vsel %vm254_vm14, %v374_v16, %v373_v13  ;;  %v557_v51 = vsel %vm555_vm0, %v232_v20, %v245_v35  ;;  %v925_v35 = vld [vmem:[%s1177_s3] ss:$0 sm:$0xff] }
  0xfd   :  { %v250_v60 = vsel %vm243_vm12, %v246_v14, %v249_v9  ;;  %v378_v21 = vsel %vm253_vm15, %v995_v19, %v375_v17  ;;  %v561_v56 = vsel %vm554_vm2, %v557_v51, %v560_v55  ;;  %805 = vmatpush.bf16.msra.mxu1 %v906_v48 }
  0xfe   :  { %v1135_v61 = vsel %vm241_vm13, nan, %v250_v60  ;;  %v380_v24 = vmul.f32 %v378_v21, %v378_v21  ;;  %v562_v62 = vsel %vm241_vm13, nan, %v561_v56 }
  0xff   :  { %v718_v42 = vmul.f32 0.125, %v562_v62  ;;  %v406_v20 = vmul.f32 0.125, %v1135_v61 }
 0x100   :  { %v388_v49 = vmul.f32 -0.00019511016, %v380_v24  ;;  %v381_v32 = vmul.f32 -0.001358992, %v380_v24 }
 0x101   :  { %806 = vmatpush.bf16.msra.mxu1 %v905_v57 }
 0x102   :  { %v389_v46 = vadd.f32 0.008332121, %v388_v49  ;;  %v382_v33 = vadd.f32 0.041655596, %v381_v32 }
 0x104   :  { %v390_v37 = vmul.f32 %v389_v46, %v380_v24  ;;  %v383_v3 = vmul.f32 %v382_v33, %v380_v24 }
 0x105   :  { %807 = vmatpush.bf16.msra.mxu1 %v904_v11 }
 0x106   :  { %v391_v41 = vadd.f32 -0.16666654, %v390_v37  ;;  %v384_v43 = vadd.f32 -0.4999988, %v383_v3 }
 0x108   :  { %v392_v27 = vmul.f32 %v391_v41, %v380_v24  ;;  %v385_v44 = vmul.f32 %v384_v43, %v380_v24 }
 0x10a   :  { %v393_v50 = vadd.f32 1.0, %v392_v27  ;;  %v386_v12 = vadd.f32 1.0, %v385_v44 }
 0x10c   :  { %v394_v53 = vmul.f32 %v393_v50, %v378_v21  ;;  %v402_v54 = vxor.u32 2147483648, %v386_v12 }
 0x10e   :  { %v399_v58 = vxor.u32 2147483648, %v394_v53  ;;  %v403_v59 = vsel %vm401_vm3, %v402_v54, %v394_v53  ;;  %v715_v36 = vsel %vm713_vm8, %v402_v54, %v394_v53 }
 0x110   :  { %v712_v0 = vsel %vm710_vm7, %v386_v12, %v399_v58  ;;  %v400_v1 = vsel %vm398_vm5, %v386_v12, %v399_v58 }
 0x111   :  { %v716_v2 = vsel %vm709_vm6, %v712_v0, %v715_v36  ;;  %v404_v39 = vsel %vm397_vm4, %v400_v1, %v403_v59 }
 0x112   :  { %v717_v4 = vsel %vm395_vm9, nan, %v716_v2  ;;  %v405_v5 = vsel %vm395_vm9, nan, %v404_v39 }
 0x113   :  { %v719_v45 = vmul.f32 0.125, %v717_v4  ;;  %v407_v19 = vmul.f32 0.125, %v405_v5 }
 0x115   :  { %v920_v29 = vpack.i.bf16 %v719_v45, %v718_v42 }
 0x117   :  { %921 = vrot.lane.b32.xlu0 %v920_v29, %s933_s21 }
 0x189   :  { %v922_v6 = vpop.permute.xlu0 %921 }
 0x18a   :  { %v924_v7 = vunpack.i.h.bf16 %v922_v6  ;;  %v923_v8 = vunpack.i.l.bf16 %v922_v6 }
 0x18c   :  { %v729_v30 = vsel %vm728_vm10, %v406_v20, %v923_v8  ;;  %v730_v63 = vsel %vm728_vm10, %v407_v19, %v924_v7 }
 0x18d   :  { %v731_v26 = vpack.c.bf16 %v730_v63, %v729_v30 }
 0x18f   :  { %808 = vmatmul.bf16.vlgmr.msra.gmra.mxu1 %v731_v26 }
 0x20c   :  { %v809_v9 = vpop.f32.mrf.mxu1 }
 0x20d   :  { %v810_v10 = vadd.f32 %v925_v35, %v809_v9 }
 0x20f   :  { %814 = vst [vmem:[%s1178_s4] sm:$0xff] %v810_v10 }
 0x214   :  { %v811_v13 = vpop.f32.mrf.mxu1 }
 0x215   :  { %v812_v14 = vadd.f32 %v925_v35, %v811_v13 }
 0x217   :  { %815 = vst [vmem:[%s1178_s4 + $0x8] sm:$0xff] %v812_v14 }

</bundles_post_ra>
